<compile_context>
chip_gen: v6e
topology: v6e:2x2x1
jax: 0.10.0
libtpu: 0.0.40
codegen_flags: <defaults>
</compile_context>

<pallas_src>
import jax
import jax.numpy as jnp
from jax import lax
from jax.experimental import pallas as pl
from jax.experimental.pallas import tpu as pltpu

_VMEM_LIMIT_BYTES = 32 * 1024 * 1024
_LANE = 128
_MAX_TILE_N = 1024


def _choose_tile_n(n):
    """Node-dim tile: multiple of 128 lanes, capped at 1024 (fits all gens' VMEM)."""
    n_up = max(_LANE, ((n + _LANE - 1) // _LANE) * _LANE)
    return min(_MAX_TILE_N, n_up)


# --------------------- standalone scoring kernel (weight.mm) ------------------
def _brie_scores_kernel(w_ref, e_ref, o_ref):
    # w_ref: (C, D), e_ref: (D, tn), o_ref: (C, tn) == (weight @ embeds)[:, tile]
    o_ref[...] = jnp.dot(
        w_ref[...].astype(jnp.bfloat16),
        e_ref[...].astype(jnp.bfloat16),
        preferred_element_type=jnp.float32,
    ).astype(o_ref.dtype)


def brie_scores(weight, embeds):
    """scores.t() = (weight @ embeds).T, tiled over N with lane-dense (C, tn) blocks."""
    C, D = weight.shape
    D2, N = embeds.shape
    assert D == D2

    tn = _choose_tile_n(N)
    num_tiles = pl.cdiv(N, tn)
    n_pad = num_tiles * tn
    e = embeds if n_pad == N else jnp.pad(embeds, ((0, 0), (0, n_pad - N)))

    cost = pl.CostEstimate(
        flops=2 * n_pad * D * C,
        transcendentals=0,
        bytes_accessed=4 * (D * n_pad + C * D + C * n_pad),
    )

    scores_cn = pl.pallas_call(
        _brie_scores_kernel,
        out_shape=jax.ShapeDtypeStruct((C, n_pad), jnp.float32),
        grid=(num_tiles,),
        in_specs=[
            pl.BlockSpec((C, D), lambda i: (0, 0)),    # classifier weight (full)
            pl.BlockSpec((D, tn), lambda i: (0, i)),   # embeds tile
        ],
        out_specs=pl.BlockSpec((C, tn), lambda i: (0, i)),
        compiler_params=pltpu.CompilerParams(
            dimension_semantics=("parallel",),
            vmem_limit_bytes=_VMEM_LIMIT_BYTES,
        ),
        cost_estimate=cost,
    )(weight, e)
    return scores_cn[:, :N].T                           # (N, C) == scores.t()


# ------------- fused kernel: inter stand-in + scoring + loss partials ---------
def _brie_fused_kernel(x_ref, wemb_ref, w_ref, scores_ref, losspart_ref):
    # x_ref:        (tn, F) node-feature tile (f32)
    # wemb_ref:     (D, F)  synthetic inter-aggregator projection (f32, full)
    # w_ref:        (C, D)  BRIE classifier weight (f32, full)
    # scores_ref:   (C, tn) lane-dense scores tile == (weight @ embeds)[:, tile]
    # losspart_ref: (1, 8, 128) per-tile partial sum of embeds**2
    x = x_ref[...].astype(jnp.bfloat16)
    wemb = wemb_ref[...].astype(jnp.bfloat16)
    w = w_ref[...].astype(jnp.bfloat16)

    # embeds tile, (D, tn) = tanh(W_embed @ x.T): bf16 MXU operands, f32
    # accumulation; tanh in f32 on the EUP slot.
    pre = lax.dot_general(
        wemb, x,
        dimension_numbers=(((1,), (1,)), ((), ())),
        preferred_element_type=jnp.float32,
    )
    e = jnp.tanh(pre)                                   # (D, tn), f32

    # scores tile: MXU-natural weight @ embeds -> (C, tn), lane-dense stores.
    scores_ref[...] = jnp.dot(
        w, e.astype(jnp.bfloat16), preferred_element_type=jnp.float32
    ).astype(scores_ref.dtype)

    # Contrastive-loss partial sum for this tile (padded columns are exactly 0,
    # so they contribute nothing).  Reduced across tiles outside the kernel.
    psum = jnp.sum(e * e)
    losspart_ref[...] = jnp.full(losspart_ref.shape, psum, dtype=losspart_ref.dtype)


def brie_forward_pallas(weight, w_embed, node_feats):
    C, D = weight.shape
    D2, F = w_embed.shape
    N, F2 = node_feats.shape
    assert D == D2 and F == F2

    tn = _choose_tile_n(N)
    num_tiles = pl.cdiv(N, tn)
    n_pad = num_tiles * tn
    x = node_feats if n_pad == N else jnp.pad(node_feats, ((0, n_pad - N), (0, 0)))

    cost = pl.CostEstimate(
        flops=2 * n_pad * (F * D + D * C),
        transcendentals=n_pad * D,
        bytes_accessed=4 * (n_pad * F + D * F + C * D + C * n_pad + num_tiles * 8 * 128),
    )

    scores_cn, loss_parts = pl.pallas_call(
        _brie_fused_kernel,
        out_shape=(
            jax.ShapeDtypeStruct((C, n_pad), jnp.float32),
            jax.ShapeDtypeStruct((num_tiles, 8, 128), jnp.float32),
        ),
        grid=(num_tiles,),
        in_specs=[
            pl.BlockSpec((tn, F), lambda i: (i, 0)),   # node-feature tile
            pl.BlockSpec((D, F), lambda i: (0, 0)),    # inter projection (full)
            pl.BlockSpec((C, D), lambda i: (0, 0)),    # classifier weight (full)
        ],
        out_specs=(
            pl.BlockSpec((C, tn), lambda i: (0, i)),
            pl.BlockSpec((1, 8, 128), lambda i: (i, 0, 0)),
        ),
        compiler_params=pltpu.CompilerParams(
            dimension_semantics=("parallel",),
            vmem_limit_bytes=_VMEM_LIMIT_BYTES,
        ),
        cost_estimate=cost,
    )(x, w_embed, weight)

    scores_t = scores_cn[:, :N].T                       # (N, C) == scores.t()
    feat_contra_loss = jnp.sum(loss_parts[:, 0, 0]) / (D * N)
    return scores_t, feat_contra_loss


# ---------------------- synthetic inter-relation aggregator -------------------
# TODO(synk): the real InterAgg module's forward (graph neighbor aggregation +
# contrastive loss) is not defined in BRIELayer; this deterministic
# tanh-projection stand-in only produces (embed_dim, num_nodes) embeddings and
# a scalar loss so the BRIE hot path can be exercised / fused.
def synthetic_inter(w_embed, node_feats):
    embeds = jnp.tanh(w_embed @ node_feats.T)           # (D, N)
    feat_contra_loss = jnp.mean(embeds ** 2)            # scalar stand-in
    return embeds, feat_contra_loss


def brie_forward_xla(weight, w_embed, node_feats):
    embeds, feat_contra_loss = synthetic_inter(w_embed, node_feats)
    return (weight @ embeds).T, feat_contra_loss


def brie_forward(weight, w_embed, node_feats, *, min_nodes_for_pallas=2048,
                 force_pallas=False):
    # At toy node counts the fixed per-call / per-step Pallas overhead dominates
    # and XLA fuses the tiny matmuls fine; use the kernel at realistic N (or
    # when forced, as in the test below).
    if force_pallas or node_feats.shape[0] >= min_nodes_for_pallas:
        return brie_forward_pallas(weight, w_embed, node_feats)
    return brie_forward_xla(weight, w_embed, node_feats)


if __name__ == "__main__":
    num_classes = 2
    embed_dim = 32
    feat_dim = 16
    num_nodes = 8

    key = jax.random.PRNGKey(0)
    k_w, k_agg, k_x, k_x2 = jax.random.split(key, 4)

    # xavier_uniform_ init of self.weight: U(-b, b), b = sqrt(6 / (fan_in + fan_out))
    bound = (6.0 / (num_classes + embed_dim)) ** 0.5
    weight = jax.random.uniform(
        k_w, (num_classes, embed_dim), dtype=jnp.float32, minval=-bound, maxval=bound)
    w_embed = jax.random.normal(k_agg, (embed_dim, feat_dim), dtype=jnp.float32) * 0.1
    node_feats = jax.random.normal(k_x, (num_nodes, feat_dim), dtype=jnp.float32)

    # --- fused kernel (inter stand-in + scoring), tiny-N path, forced Pallas ---
    scores_t, loss = brie_forward(weight, w_embed, node_feats, force_pallas=True)
    jax.block_until_ready(scores_t)
    jax.block_until_ready(loss)

    embeds_ref, loss_ref = synthetic_inter(w_embed, node_feats)
    scores_ref = (weight @ embeds_ref).T
    assert scores_t.shape == (num_nodes, num_classes)
    # bf16 MXU operands + f32 accumulation -> compare loosely against f32 reference
    assert jnp.allclose(scores_t, scores_ref, atol=5e-2, rtol=5e-2)
    assert jnp.allclose(loss, loss_ref, atol=5e-2, rtol=5e-2)

    # --- standalone scoring kernel: (weight.mm(embeds)).T on given embeds -----
    scores_t2 = brie_scores(weight, embeds_ref)
    jax.block_until_ready(scores_t2)
    assert scores_t2.shape == (num_nodes, num_classes)
    assert jnp.allclose(scores_t2, scores_ref, atol=5e-2, rtol=5e-2)

    # --- multi-tile / padded-grid check (tn=1024, 2 tiles, 512 padded cols) ---
    num_nodes_big = 1536
    node_feats_big = jax.random.normal(
        k_x2, (num_nodes_big, feat_dim), dtype=jnp.float32)
    scores_big, loss_big = brie_forward(
        weight, w_embed, node_feats_big, force_pallas=True)
    jax.block_until_ready(scores_big)
    jax.block_until_ready(loss_big)
    embeds_big, loss_big_ref = synthetic_inter(w_embed, node_feats_big)
    scores_big_ref = (weight @ embeds_big).T
    assert scores_big.shape == (num_nodes_big, num_classes)
    assert jnp.allclose(scores_big, scores_big_ref, atol=5e-2, rtol=5e-2)
    assert jnp.allclose(loss_big, loss_big_ref, atol=5e-2, rtol=5e-2)

    print("KERNEL_OK")
</pallas_src>

<mosaic_0001>
module attributes {stable_mosaic.version = 11 : i64} {
  func.func @_brie_fused_kernel(%arg0: i32, %arg1: memref<128x16xf32, #tpu.memory_space<vmem>>, %arg2: memref<32x16xf32, #tpu.memory_space<vmem>>, %arg3: memref<2x32xf32, #tpu.memory_space<vmem>>, %arg4: memref<2x128xf32, #tpu.memory_space<vmem>>, %arg5: memref<1x8x128xf32, #tpu.memory_space<vmem>>) attributes {dimension_semantics = [#tpu.dimension_semantics<parallel>], iteration_bounds = array<i64: 1>, scalar_prefetch = 0 : i64, scratch_operands = 0 : i64, tpu.core_type = #tpu.core_type<tc>, window_params = [{transform_indices = @transform_0, window_bounds = array<i64: 128, 16>}, {pipeline_mode = #tpu.pipeline_mode<synchronous>, transform_indices = @transform_1, window_bounds = array<i64: 32, 16>}, {pipeline_mode = #tpu.pipeline_mode<synchronous>, transform_indices = @transform_2, window_bounds = array<i64: 2, 32>}, {transform_indices = @transform_3, window_bounds = array<i64: 2, 128>}, {transform_indices = @transform_4, window_bounds = array<i64: 1, 8, 128>}]} {
    %c0 = arith.constant 0 : index
    %c0_0 = arith.constant 0 : index
    %0 = vector.load %arg1[%c0, %c0_0] : memref<128x16xf32, #tpu.memory_space<vmem>>, vector<128x16xf32>
    %1 = arith.truncf %0 : vector<128x16xf32> to vector<128x16xbf16>
    %c0_1 = arith.constant 0 : index
    %c0_2 = arith.constant 0 : index
    %2 = vector.load %arg2[%c0_1, %c0_2] : memref<32x16xf32, #tpu.memory_space<vmem>>, vector<32x16xf32>
    %3 = arith.truncf %2 : vector<32x16xf32> to vector<32x16xbf16>
    %c0_3 = arith.constant 0 : index
    %c0_4 = arith.constant 0 : index
    %4 = vector.load %arg3[%c0_3, %c0_4] : memref<2x32xf32, #tpu.memory_space<vmem>>, vector<2x32xf32>
    %5 = arith.truncf %4 : vector<2x32xf32> to vector<2x32xbf16>
    %cst = arith.constant dense<0.000000e+00> : vector<32x128xf32>
    %6 = tpu.matmul %3, %1, %cst {dimension_numbers = #tpu.dot_dimension_numbers<[1], [1], [0], [0], [0, 0, 1, 0], [], []>} : vector<32x16xbf16>, vector<128x16xbf16>, vector<32x128xf32> -> vector<32x128xf32>
    %7 = math.tanh %6 : vector<32x128xf32>
    %8 = arith.truncf %7 : vector<32x128xf32> to vector<32x128xbf16>
    %cst_5 = arith.constant dense<0.000000e+00> : vector<2x128xf32>
    %9 = tpu.matmul %5, %8, %cst_5 {dimension_numbers = #tpu.dot_dimension_numbers<[1], [0], [0], [1], [0, 0, 1, 1], [], []>} : vector<2x32xbf16>, vector<32x128xbf16>, vector<2x128xf32> -> vector<2x128xf32>
    %c0_6 = arith.constant 0 : index
    %c0_7 = arith.constant 0 : index
    %10 = vector.load %arg4[%c0_6, %c0_7] : memref<2x128xf32, #tpu.memory_space<vmem>>, vector<2x128xf32>
    tpu.vector_store %arg4[%c0_6, %c0_7], %9 {strides = array<i32>} : memref<2x128xf32, #tpu.memory_space<vmem>>, vector<2x128xf32>,
    %11 = arith.mulf %7, %7 : vector<32x128xf32>
    %12 = vector.shape_cast %11 : vector<32x128xf32> to vector<1x32x128xf32>
    %cst_8 = arith.constant dense<0.000000e+00> : vector<1xf32>
    %13 = vector.multi_reduction <add>, %12, %cst_8 [1, 2] : vector<1x32x128xf32> to vector<1xf32>
    %14 = vector.shape_cast %13 : vector<1xf32> to vector<1x1x1xf32>
    %15 = vector.extract %14[0, 0, 0] : f32 from vector<1x1x1xf32>
    %16 = vector.broadcast %15 : f32 to vector<1x8x128xf32>
    %c0_9 = arith.constant 0 : index
    %c0_10 = arith.constant 0 : index
    %c0_11 = arith.constant 0 : index
    %17 = vector.load %arg5[%c0_9, %c0_10, %c0_11] : memref<1x8x128xf32, #tpu.memory_space<vmem>>, vector<1x8x128xf32>
    tpu.vector_store %arg5[%c0_9, %c0_10, %c0_11], %16 {strides = array<i32>} : memref<1x8x128xf32, #tpu.memory_space<vmem>>, vector<1x8x128xf32>,
    return
  }
  func.func @transform_0(%arg0: i32) -> (i32, i32) {
    %c0_i32 = arith.constant 0 : i32
    %c0_i32_0 = arith.constant 0 : i32
    return %arg0, %c0_i32 : i32, i32
  }
  func.func @transform_1(%arg0: i32) -> (i32, i32) {
    %c0_i32 = arith.constant 0 : i32
    %c0_i32_0 = arith.constant 0 : i32
    %c0_i32_1 = arith.constant 0 : i32
    return %c0_i32, %c0_i32_0 : i32, i32
  }
  func.func @transform_2(%arg0: i32) -> (i32, i32) {
    %c0_i32 = arith.constant 0 : i32
    %c0_i32_0 = arith.constant 0 : i32
    %c0_i32_1 = arith.constant 0 : i32
    return %c0_i32, %c0_i32_0 : i32, i32
  }
  func.func @transform_3(%arg0: i32) -> (i32, i32) {
    %c0_i32 = arith.constant 0 : i32
    %c0_i32_0 = arith.constant 0 : i32
    return %c0_i32, %arg0 : i32, i32
  }
  func.func @transform_4(%arg0: i32) -> (i32, i32, i32) {
    %c0_i32 = arith.constant 0 : i32
    %c0_i32_0 = arith.constant 0 : i32
    %c0_i32_1 = arith.constant 0 : i32
    return %arg0, %c0_i32, %c0_i32_0 : i32, i32, i32
  }
}

</mosaic_0001>

<bundles_post_ra>
// kernel: tpu_custom_call.1
= control target key start
LH: loop header
LB: loop body
LE: loop exit
PB: predicated region body
PF: predicated region fallthrough
CT: control target
= control target key end

     0   :  { %10 = vsyncpa [#allocation3], 0  ;;  %vm51_vm0 = vcmask 130048   ;;  %s454_s0 = inlined_call_operand.vmem [shape: f32[128,16], index: 0, kind: input, shape index: {}]   ;;  %s455_s1 = inlined_call_operand.vmem [shape: f32[32,16], index: 1, kind: input, shape index: {}]   ;;  %s456_s2 = inlined_call_operand.vmem [shape: f32[2,32], index: 2, kind: input, shape index: {}]   ;;  %s457_s3 = inlined_call_operand.hbm [shape: f32[2,128], index: 3, kind: output, shape index: {0}]   ;;  %s458_s4 = inlined_call_operand.hbm [shape: f32[1,8,128], index: 4, kind: output, shape index: {1}]  }
   0x1   :  { %v33_v0 = vld [vmem:[%s454_s0 + $0x70] sm:$0xff]  ;;  %v34_v1 = vld [vmem:[%s454_s0 + $0x78] sm:$0xff]  ;;  %v31_v2 = vld [vmem:[%s454_s0 + $0x60] sm:$0xff] }
   0x2   :  { %v42_v3 = vpack.c.bf16 %v34_v1, %v33_v0  ;;  %v32_v4 = vld [vmem:[%s454_s0 + $0x68] sm:$0xff]  ;;  %v43_v7 = vld [vmem:[%s455_s1] sm:$0xff]  ;;  %v29_v9 = vld [vmem:[%s454_s0 + $0x50] sm:$0xff] }
   0x3   :  { %v41_v5 = vpack.c.bf16 %v32_v4, %v31_v2  ;;  %v44_v8 = vld [vmem:[%s455_s1 + $0x8] sm:$0xff]  ;;  %v30_v10 = vld [vmem:[%s454_s0 + $0x58] sm:$0xff] }
   0x4   :  { %272 = vmatprep.subr.msk.bf16.mxu0 %vm51_vm0, %v42_v3  ;;  %v80_v6 = vsel %vm51_vm0, %v42_v3, 0  ;;  %v47_v11 = vpack.c.bf16 %v44_v8, %v43_v7 }
   0x5   :  { %245 = vmatpush3.bf16.xpose.msra.mxu0 %v80_v6 }
   0x6   :  { %273 = vmatprep.subr.msk.bf16.mxu0 %vm51_vm0, %v41_v5 }
   0x7   :  { %11 = vsyncpa [#allocation5], 0  ;;  %260 = vmatprep.mubr.msk.bf16.mxu0 %vm51_vm0, %v47_v11  ;;  %v77_v12 = vsel %vm51_vm0, %v41_v5, 0  ;;  %v40_v13 = vpack.c.bf16 %v30_v10, %v29_v9  ;;  %v27_v14 = vld [vmem:[%s454_s0 + $0x40] sm:$0xff]  ;;  %v28_v15 = vld [vmem:[%s454_s0 + $0x48] sm:$0xff]  ;;  %v338_v38 = vmov 0.0  }
   0x8   :  { %v39_v17 = vpack.c.bf16 %v28_v15, %v27_v14  ;;  %v25_v18 = vld [vmem:[%s454_s0 + $0x30] sm:$0xff]  ;;  %v26_v19 = vld [vmem:[%s454_s0 + $0x38] sm:$0xff]  ;;  %v23_v22 = vld [vmem:[%s454_s0 + $0x20] sm:$0xff]  ;;  %264 = vmatprep.subr.bf16.mxu1 %v338_v38  ;;  %vm339_vm1 = vmmov 0   ;;  %vm137_vm2 = vcmask 261120  }
   0x9   :  { %v74_v16 = vsel %vm51_vm0, %v40_v13, 0  ;;  %v38_v21 = vpack.c.bf16 %v26_v19, %v25_v18  ;;  %v24_v23 = vld [vmem:[%s454_s0 + $0x28] sm:$0xff]  ;;  %v21_v26 = vld [vmem:[%s454_s0 + $0x10] sm:$0xff]  ;;  %v22_v27 = vld [vmem:[%s454_s0 + $0x18] sm:$0xff]  ;;  %268 = vmatprep.mubr.msk.bf16.mxu1 %vm339_vm1, %v338_v38 }
   0xa   :  { %v71_v20 = vsel %vm51_vm0, %v39_v17, 0  ;;  %v37_v25 = vpack.c.bf16 %v24_v23, %v23_v22  ;;  %v36_v29 = vpack.c.bf16 %v22_v27, %v21_v26  ;;  %v19_v30 = vld [vmem:[%s454_s0] sm:$0xff]  ;;  %v20_v31 = vld [vmem:[%s454_s0 + $0x8] sm:$0xff]  ;;  %v45_v35 = vld [vmem:[%s455_s1 + $0x10] sm:$0xff] }
   0xb   :  { %v68_v24 = vsel %vm51_vm0, %v38_v21, 0  ;;  %v35_v33 = vpack.c.bf16 %v20_v31, %v19_v30  ;;  %v46_v36 = vld [vmem:[%s455_s1 + $0x18] sm:$0xff]  ;;  %v49_v48 = vld [vmem:[%s456_s2] sm:$0x3]  ;;  %s340_s2 = smov [#allocation2]  }
   0xc   :  { %v65_v28 = vsel %vm51_vm0, %v37_v25, 0  ;;  %v62_v32 = vsel %vm51_vm0, %v36_v29, 0  ;;  %v48_v37 = vpack.c.bf16 %v46_v36, %v45_v35  ;;  %v50_v54 = vpack.c.bf16 %v49_v48, %v49_v48  ;;  %s206_s29 = sshll.u32 %s340_s2, 4  ;;  %s207_s29 = int_to_ptr.vmem [resolvable:$true] %s206_s29 }
   0xd   :  { %247 = vmatpush3.bf16.xpose.msra.mxu0 %v77_v12  ;;  %v59_v34 = vsel %vm51_vm0, %v35_v33, 0  ;;  %s294_s30 = scalar_lea.vmem %s207_s29, 32  ;;  %p299_p1 = scmp.lt.s32.totalorder %s207_s29, %s207_s29 }
   0xe   :  { %274 = vmatprep.subr.msk.bf16.mxu0 %vm51_vm0, %v40_v13  ;;  %p295_p0 = scmp.ne.s32.totalorder %s207_s29, %s294_s30  ;;  %p300_p2 = scmp.lt.s32.totalorder %s294_s30, %s294_s30 }
  0x10   :  { %p301_p3 = por %p300_p2, %p299_p1 }
  0x12   :  { %p302_p4 = pnand %p301_p3, %p295_p0 }
  0x15   :  { %249 = vmatpush3.bf16.xpose.msra.mxu0 %v74_v16 }
  0x16   :  { %275 = vmatprep.subr.msk.bf16.mxu0 %vm51_vm0, %v39_v17 }
  0x1d   :  { %251 = vmatpush3.bf16.xpose.msra.mxu0 %v71_v20 }
  0x1e   :  { %276 = vmatprep.subr.msk.bf16.mxu0 %vm51_vm0, %v38_v21 }
  0x25   :  { %253 = vmatpush3.bf16.xpose.msra.mxu0 %v68_v24 }
  0x26   :  { %277 = vmatprep.subr.msk.bf16.mxu0 %vm51_vm0, %v37_v25 }
  0x2d   :  { %255 = vmatpush3.bf16.xpose.msra.mxu0 %v65_v28 }
  0x2e   :  { %278 = vmatprep.subr.msk.bf16.mxu0 %vm51_vm0, %v36_v29 }
  0x35   :  { %257 = vmatpush3.bf16.xpose.msra.mxu0 %v62_v32 }
  0x36   :  { %279 = vmatprep.subr.msk.bf16.mxu0 %vm51_vm0, %v35_v33 }
  0x3d   :  { %259 = vmatpush3.bf16.xpose.msra.mxu0 %v59_v34 }
  0x44   :  { %261 = vmatmul.mubr.msk.bf16.vlgmr.msra.gmra.mxu0 %vm51_vm0, %v48_v37 }
 0x104   :  { %v262_v39 = vpop.f32.mrf.mxu0 }
 0x105   :  { %286 = vtanh.f32 %v262_v39 }
 0x106   :  { %v116_v40 = vpop.f32.mrf.mxu0 }
 0x107   :  { %288 = vtanh.f32 %v116_v40 }
 0x108   :  { %v263_v41 = vpop.f32.mrf.mxu0 }
 0x109   :  { %290 = vtanh.f32 %v263_v41 }
 0x10a   :  { %v119_v42 = vpop.f32.mrf.mxu0 }
 0x10b   :  { %292 = vtanh.f32 %v119_v42 }
 0x112   :  { %v287_v43 = vpop.eup %286 }
 0x113   :  { %v184_v52 = vmul.f32 %v287_v43, %v287_v43 }
 0x114   :  { %v289_v44 = vpop.eup %288 }
 0x115   :  { %v182_v49 = vmul.f32 %v289_v44, %v289_v44 }
 0x116   :  { %v291_v45 = vpop.eup %290 }
 0x117   :  { %v136_v46 = vpack.c.bf16 %v291_v45, %v287_v43  ;;  %v185_v55 = vmul.f32 %v291_v45, %v291_v45 }
 0x118   :  { %v293_v47 = vpop.eup %292 }
 0x119   :  { %265 = vmatpush3.bf16.msra.mxu1 %v136_v46  ;;  %v183_v50 = vmul.f32 %v293_v47, %v293_v47  ;;  %v135_v51 = vpack.c.bf16 %v293_v47, %v289_v44 }
 0x11a   :  { %266 = vmatprep.subr.bf16.mxu1 %v338_v38 }
 0x11b   :  { %v186_v53 = vadd.f32 %v183_v50, %v182_v49 }
 0x11d   :  { %267 = vmatpush3.bf16.msra.mxu1 %v135_v51  ;;  %v187_v56 = vadd.f32 %v186_v53, %v184_v52 }
 0x11f   :  { %v188_v57 = vadd.f32 %v187_v56, %v185_v55 }
 0x120   :  { %269 = vmatmul.mubr.msk.bf16.vlgmr.msra.gmra.mxu1 %vm137_vm2, %v50_v54 }
 0x121   :  { %189 = vadd.xlane.f32.xlu0 %v188_v57 }
 0x1aa   :  { %v190_v58 = vpop.xlane.xlu0 %189 }
 0x1ab   :  { %v191_v59 = vrot.slane %v190_v58, 4 }
 0x1ad   :  { %v192_v60 = vadd.f32 %v191_v59, %v190_v58 }
 0x1af   :  { %v193_v61 = vrot.slane %v192_v60, 2 }
 0x1b1   :  { %v194_v62 = vadd.f32 %v193_v61, %v192_v60 }
 0x1b3   :  { %v195_v63 = vrot.slane %v194_v62, 1 }
 0x1b5   :  { %v196_v0 = vadd.f32 %v195_v63, %v194_v62 }
 0x1b7   :  { %280 = vpush %v196_v0 }
 0x1e0   :  { %v175_v1 = vpop.f32.mrf.mxu1 }
 0x1e1   :  { %181 = vst [vmem:[#allocation2] sm:$0x3] %v175_v1 }
 0x1e2   :  { %v270_v2 = vpop.f32.mrf.mxu1 }
 0x1e3   :  { %305 = shalt.err (!%p302_p4)
}
 0x1e4   :  { %209 = dma.vmem_to_hbm [thread:$0]  %s207_s29, 32, %s457_s3, [#allocation3]   ;;  %v178_v3 = vpop.f32.mrf.mxu1 }
 0x1e5   :  { %s341_s7 = smov [#allocation4]  }
 0x1e6   :  { %s216_s8 = sshll.u32 %s341_s7, 4  ;;  %v271_v4 = vpop.f32.mrf.mxu1  ;;  %s217_s8 = int_to_ptr.vmem [resolvable:$true] %s216_s8 }
 0x1e7   :  { %s314_s10 = scalar_lea.vmem %s217_s8, 128  ;;  %p319_p6 = scmp.lt.s32.totalorder %s217_s8, %s217_s8 }
 0x1e8   :  { %s281_s9 = spop %280  ;;  %p315_p5 = scmp.ne.s32.totalorder %s217_s8, %s314_s10 }
 0x1e9   :  { %v198_v5 = vstv %s281_s9  ;;  %p320_p7 = scmp.lt.s32.totalorder %s314_s10, %s314_s10 }
 0x1ea   :  { %199 = vst [vmem:[#allocation4] sm:$0xff] %v198_v5 }
 0x1eb   :  { %p321_p8 = por %p320_p7, %p319_p6 }
 0x1ed   :  { %p322_p9 = pnand %p321_p8, %p315_p5 }
 0x1ef   :  { %325 = shalt.err (!%p322_p9)
}
 0x1f0   :  { %219 = dma.vmem_to_hbm [thread:$0]  %s217_s8, 128, %s458_s4, [#allocation5]  }
 0x1f1   :  { %334 = dma.done.wait [#allocation3], 32  }
 0x1f2   :  { %335 = vsyncadd [#allocation3], 4294967264 }
 0x1f3   :  { %336 = dma.done.wait [#allocation5], 128  }
 0x1f4   :  { %337 = vsyncadd [#allocation5], 4294967168 }
 0x1f5   :  { %226 = vsyncpa [#allocation3], 1 }
 0x1f6   :  { %227 = vsyncpa [#allocation5], 1 }

</bundles_post_ra>
